<compile_context>
chip_gen: v7x
topology: tpu7x:2x2x1
jax: 0.10.0
libtpu: 0.0.40
codegen_flags: <defaults>
</compile_context>

<pallas_src>
import functools

import jax
import jax.numpy as jnp
from jax.experimental import pallas as pl
from jax.experimental.pallas import tpu as pltpu

INPUT_DIM = 1024
HIDDEN1 = 512
HIDDEN2 = 32
OUT_DIM = 1

MIN_TILE_B = 256   # one MXU pass of rows on v6e/v7x
MAX_TILE_B = 1024  # keeps double-buffered x + weights + temporaries < ~14 MiB


def _choose_tile_b(batch):
    """Pick the batch tile from the (static) batch size.

    * batch <= 256: a single (near-)exact block; perf is irrelevant at this
      size and an exact block avoids ragged-tail handling entirely.
    * batch  > 256: a multiple of 256 (MXU-friendly), capped at MAX_TILE_B,
      and small enough that the grid has >=2 tiles so the "parallel" batch
      axis can occupy both v7x TensorCores.
    """
    if batch <= MIN_TILE_B:
        return max(8, -(-batch // 8) * 8)          # round up to multiple of 8
    half = -(-batch // 2)                          # ceil(batch / 2)
    return min(MAX_TILE_B, -(-half // MIN_TILE_B) * MIN_TILE_B)


def _mlp_kernel(x_ref, w1_ref, b1_ref, w2_ref, b2_ref, w3_ref, b3_ref, o_ref):
    # x tile: (tile_b, 1024). astype is a no-op if the caller already supplies
    # bf16 x; all MXU matmuls accumulate in f32 via preferred_element_type.
    x = x_ref[...].astype(jnp.bfloat16)

    # Linear(1024 -> 512) + ReLU      (Dropout p=0.0 -> identity)
    h1 = jnp.dot(x, w1_ref[...], preferred_element_type=jnp.float32) + b1_ref[...]
    h1 = jnp.maximum(h1, 0.0).astype(jnp.bfloat16)

    # Linear(512 -> 32) + ReLU        (Dropout p=0.0 -> identity)
    h2 = jnp.dot(h1, w2_ref[...], preferred_element_type=jnp.float32) + b2_ref[...]
    h2 = jnp.maximum(h2, 0.0).astype(jnp.bfloat16)

    # Linear(32 -> 1): contract w3 (1, 32) against h2 (tile_b, 32) over k so
    # the per-tile result is a lane-dense (1, tile_b) row -> full unmasked
    # lane stores into the (1, n_tiles*tile_b) output slab. (This layer is
    # ~0.01% of FLOPs; even if Mosaic inserts a small transpose it is noise.)
    z = jnp.einsum("ok,bk->ob", w3_ref[...], h2,
                   preferred_element_type=jnp.float32) + b3_ref[...]

    # Exact sigmoid (EUP exp + exact reciprocal): z is only (1, tile_b), so
    # the approx reciprocal bought nothing and only loosened the numerics.
    o_ref[...] = (1.0 / (1.0 + jnp.exp(-z))).astype(o_ref.dtype)


@functools.partial(jax.jit, static_argnames=("tile_b",))
def learner_forward(x, params, *, tile_b=None):
    """x: (B, INPUT_DIM) float32 or bfloat16 -> (B, 1) float32."""
    w1, b1, w2, b2, w3, b3 = params
    B, D = x.shape
    assert D == INPUT_DIM

    if tile_b is None:
        tile_b = _choose_tile_b(B)
    n_tiles = pl.cdiv(B, tile_b)

    full = lambda shape: pl.BlockSpec(shape, lambda i: (0, 0))

    out = pl.pallas_call(
        _mlp_kernel,
        # Lane-dense output slab sized to whole tiles so every store is a full
        # (1, tile_b) row; allocated directly by pallas_call (no HBM copy of
        # x). Tail columns (from a ragged last x block) are sliced off below.
        out_shape=jax.ShapeDtypeStruct((1, n_tiles * tile_b), jnp.float32),
        grid_spec=pltpu.PrefetchScalarGridSpec(
            num_scalar_prefetch=0,
            grid=(n_tiles,),
            in_specs=[
                # x is NOT padded: Pallas clamps the DMA for the ragged last
                # block; rows past B hold garbage that flows harmlessly
                # through the elementwise epilogue and is dropped afterwards.
                pl.BlockSpec((tile_b, INPUT_DIM), lambda i: (i, 0)),  # x tile
                full((INPUT_DIM, HIDDEN1)),                           # w1 (bf16)
                full((1, HIDDEN1)),                                   # b1
                full((HIDDEN1, HIDDEN2)),                             # w2 (bf16)
                full((1, HIDDEN2)),                                   # b2
                full((OUT_DIM, HIDDEN2)),                             # w3 (bf16, (out,in))
                full((1, OUT_DIM)),                                   # b3
            ],
            out_specs=pl.BlockSpec((1, tile_b), lambda i: (0, i)),
        ),
        compiler_params=pltpu.CompilerParams(
            dimension_semantics=("parallel",),
            # Actual footprint is ~10-14 MiB at tile_b=1024 (double-buffered
            # f32 x tiles + bf16 weights + in-kernel h1 temporaries); 24 MiB
            # leaves ample headroom on every generation incl. v7x (64 MiB/TC).
            vmem_limit_bytes=24 * 1024 * 1024,
        ),
    )(x, w1, b1, w2, b2, w3, b3)

    # Layout plumbing back to the module's (B, 1) contract.
    return out[0, :B].reshape(B, OUT_DIM)


def init_params(key):
    """Xavier-normal weights (matching weight_init), zero biases.

    w1, w2 are stored (in_features, out_features); w3 keeps the PyTorch
    (out_features, in_features) = (1, 32) layout for the lane-dense epilogue.
    Weights are bf16 (MXU-native; intentional precision choice), biases f32.
    """
    def xavier_normal(k, shape, fan_in, fan_out):
        std = (2.0 / (fan_in + fan_out)) ** 0.5
        return (jax.random.normal(k, shape, jnp.float32) * std).astype(jnp.bfloat16)

    k1, k2, k3 = jax.random.split(key, 3)
    w1 = xavier_normal(k1, (INPUT_DIM, HIDDEN1), INPUT_DIM, HIDDEN1)
    b1 = jnp.zeros((1, HIDDEN1), jnp.float32)
    w2 = xavier_normal(k2, (HIDDEN1, HIDDEN2), HIDDEN1, HIDDEN2)
    b2 = jnp.zeros((1, HIDDEN2), jnp.float32)
    w3 = xavier_normal(k3, (OUT_DIM, HIDDEN2), HIDDEN2, OUT_DIM)
    b3 = jnp.zeros((1, OUT_DIM), jnp.float32)
    return (w1, b1, w2, b2, w3, b3)


def _reference_forward(x, params):
    """Pure-JAX f32 reference of the PyTorch forward."""
    w1, b1, w2, b2, w3, b3 = params
    w1, w2, w3 = (w.astype(jnp.float32) for w in (w1, w2, w3))
    h1 = jnp.maximum(x @ w1 + b1, 0.0)
    h2 = jnp.maximum(h1 @ w2 + b2, 0.0)
    return jax.nn.sigmoid(h2 @ w3.T + b3)


if __name__ == "__main__":
    key = jax.random.PRNGKey(0)
    k_params, k_x = jax.random.split(key)

    params = init_params(k_params)
    B = 16  # small test batch (single exact 16-row tile via _choose_tile_b)
    x = jax.random.normal(k_x, (B, INPUT_DIM), jnp.float32)

    out = jax.block_until_ready(learner_forward(x, params))

    ref = _reference_forward(x, params)
    assert out.shape == (B, OUT_DIM)
    assert bool(jnp.all(jnp.isfinite(out)))
    # bf16 matmul inputs (f32 accumulation) -> loosened tolerance vs f32 ref.
    assert jnp.allclose(out, ref, atol=2e-2, rtol=2e-2)

    # TODO(synk): Dropout is a no-op (p=0.0 as constructed); a training-mode
    # dropout would use pltpu.prng_seed / pltpu.prng_random_bits in-kernel.
    print("KERNEL_OK")
</pallas_src>

<mosaic_0001>
module attributes {stable_mosaic.version = 11 : i64} {
  func.func @_mlp_kernel(%arg0: i32, %arg1: memref<16x1024xf32, #tpu.memory_space<vmem>>, %arg2: memref<1024x512xbf16, #tpu.memory_space<vmem>>, %arg3: memref<1x512xf32, #tpu.memory_space<vmem>>, %arg4: memref<512x32xbf16, #tpu.memory_space<vmem>>, %arg5: memref<1x32xf32, #tpu.memory_space<vmem>>, %arg6: memref<1x32xbf16, #tpu.memory_space<vmem>>, %arg7: memref<1x1xf32, #tpu.memory_space<vmem>>, %arg8: memref<1x16xf32, #tpu.memory_space<vmem>>) attributes {dimension_semantics = [#tpu.dimension_semantics<parallel>], iteration_bounds = array<i64: 1>, scalar_prefetch = 0 : i64, scratch_operands = 0 : i64, tpu.core_type = #tpu.core_type<tc>, window_params = [{transform_indices = @transform_0, window_bounds = array<i64: 16, 1024>}, {pipeline_mode = #tpu.pipeline_mode<synchronous>, transform_indices = @transform_1, window_bounds = array<i64: 1024, 512>}, {pipeline_mode = #tpu.pipeline_mode<synchronous>, transform_indices = @transform_2, window_bounds = array<i64: 1, 512>}, {pipeline_mode = #tpu.pipeline_mode<synchronous>, transform_indices = @transform_3, window_bounds = array<i64: 512, 32>}, {pipeline_mode = #tpu.pipeline_mode<synchronous>, transform_indices = @transform_4, window_bounds = array<i64: 1, 32>}, {pipeline_mode = #tpu.pipeline_mode<synchronous>, transform_indices = @transform_5, window_bounds = array<i64: 1, 32>}, {pipeline_mode = #tpu.pipeline_mode<synchronous>, transform_indices = @transform_6, window_bounds = array<i64: 1, 1>}, {transform_indices = @transform_7, window_bounds = array<i64: 1, 16>}]} {
    %c0 = arith.constant 0 : index
    %c0_0 = arith.constant 0 : index
    %0 = vector.load %arg1[%c0, %c0_0] : memref<16x1024xf32, #tpu.memory_space<vmem>>, vector<16x1024xf32>
    %1 = arith.truncf %0 : vector<16x1024xf32> to vector<16x1024xbf16>
    %c0_1 = arith.constant 0 : index
    %c0_2 = arith.constant 0 : index
    %2 = vector.load %arg2[%c0_1, %c0_2] : memref<1024x512xbf16, #tpu.memory_space<vmem>>, vector<1024x512xbf16>
    %cst = arith.constant dense<0.000000e+00> : vector<16x512xf32>
    %3 = tpu.matmul %1, %2, %cst {dimension_numbers = #tpu.dot_dimension_numbers<[1], [0], [0], [1], [0, 0, 1, 1], [], []>} : vector<16x1024xbf16>, vector<1024x512xbf16>, vector<16x512xf32> -> vector<16x512xf32>
    %c0_3 = arith.constant 0 : index
    %c0_4 = arith.constant 0 : index
    %4 = vector.load %arg3[%c0_3, %c0_4] : memref<1x512xf32, #tpu.memory_space<vmem>>, vector<1x512xf32>
    %5 = vector.broadcast %4 : vector<1x512xf32> to vector<16x512xf32>
    %6 = arith.addf %3, %5 : vector<16x512xf32>
    %cst_5 = arith.constant 0.000000e+00 : f32
    %7 = vector.broadcast %cst_5 : f32 to vector<16x512xf32>
    %8 = arith.maximumf %6, %7 : vector<16x512xf32>
    %9 = arith.truncf %8 : vector<16x512xf32> to vector<16x512xbf16>
    %c0_6 = arith.constant 0 : index
    %c0_7 = arith.constant 0 : index
    %10 = vector.load %arg4[%c0_6, %c0_7] : memref<512x32xbf16, #tpu.memory_space<vmem>>, vector<512x32xbf16>
    %cst_8 = arith.constant dense<0.000000e+00> : vector<16x32xf32>
    %11 = tpu.matmul %9, %10, %cst_8 {dimension_numbers = #tpu.dot_dimension_numbers<[1], [0], [0], [1], [0, 0, 1, 1], [], []>} : vector<16x512xbf16>, vector<512x32xbf16>, vector<16x32xf32> -> vector<16x32xf32>
    %c0_9 = arith.constant 0 : index
    %c0_10 = arith.constant 0 : index
    %12 = vector.load %arg5[%c0_9, %c0_10] : memref<1x32xf32, #tpu.memory_space<vmem>>, vector<1x32xf32>
    %13 = vector.broadcast %12 : vector<1x32xf32> to vector<16x32xf32>
    %14 = arith.addf %11, %13 : vector<16x32xf32>
    %cst_11 = arith.constant 0.000000e+00 : f32
    %15 = vector.broadcast %cst_11 : f32 to vector<16x32xf32>
    %16 = arith.maximumf %14, %15 : vector<16x32xf32>
    %17 = arith.truncf %16 : vector<16x32xf32> to vector<16x32xbf16>
    %c0_12 = arith.constant 0 : index
    %c0_13 = arith.constant 0 : index
    %18 = vector.load %arg6[%c0_12, %c0_13] : memref<1x32xbf16, #tpu.memory_space<vmem>>, vector<1x32xbf16>
    "tpu.trace_start"() <{level = 10 : i32, message = "ok,bk->ob"}> : () -> ()
    %cst_14 = arith.constant dense<0.000000e+00> : vector<1x16xf32>
    %19 = tpu.matmul %18, %17, %cst_14 {dimension_numbers = #tpu.dot_dimension_numbers<[1], [1], [0], [0], [0, 0, 1, 0], [], []>} : vector<1x32xbf16>, vector<16x32xbf16>, vector<1x16xf32> -> vector<1x16xf32>
    "tpu.trace_stop"() : () -> ()
    %c0_15 = arith.constant 0 : index
    %c0_16 = arith.constant 0 : index
    %20 = vector.load %arg7[%c0_15, %c0_16] : memref<1x1xf32, #tpu.memory_space<vmem>>, vector<1x1xf32>
    %21 = vector.broadcast %20 : vector<1x1xf32> to vector<1x16xf32>
    %22 = arith.addf %19, %21 : vector<1x16xf32>
    %cst_17 = arith.constant 0.000000e+00 : f32
    %23 = vector.broadcast %cst_17 : f32 to vector<1x16xf32>
    %24 = arith.subf %23, %22 : vector<1x16xf32>
    %25 = math.exp %24 : vector<1x16xf32>
    %cst_18 = arith.constant 1.000000e+00 : f32
    %26 = vector.broadcast %cst_18 : f32 to vector<1x16xf32>
    %27 = arith.addf %26, %25 : vector<1x16xf32>
    %cst_19 = arith.constant 1.000000e+00 : f32
    %28 = vector.broadcast %cst_19 : f32 to vector<1x16xf32>
    %29 = arith.divf %28, %27 : vector<1x16xf32>
    %c0_20 = arith.constant 0 : index
    %c0_21 = arith.constant 0 : index
    %30 = vector.load %arg8[%c0_20, %c0_21] : memref<1x16xf32, #tpu.memory_space<vmem>>, vector<1x16xf32>
    tpu.vector_store %arg8[%c0_20, %c0_21], %29 {strides = array<i32>} : memref<1x16xf32, #tpu.memory_space<vmem>>, vector<1x16xf32>,
    return
  }
  func.func @transform_0(%arg0: i32) -> (i32, i32) {
    %c0_i32 = arith.constant 0 : i32
    %c0_i32_0 = arith.constant 0 : i32
    return %arg0, %c0_i32 : i32, i32
  }
  func.func @transform_1(%arg0: i32) -> (i32, i32) {
    %c0_i32 = arith.constant 0 : i32
    %c0_i32_0 = arith.constant 0 : i32
    %c0_i32_1 = arith.constant 0 : i32
    return %c0_i32, %c0_i32_0 : i32, i32
  }
  func.func @transform_2(%arg0: i32) -> (i32, i32) {
    %c0_i32 = arith.constant 0 : i32
    %c0_i32_0 = arith.constant 0 : i32
    %c0_i32_1 = arith.constant 0 : i32
    return %c0_i32, %c0_i32_0 : i32, i32
  }
  func.func @transform_3(%arg0: i32) -> (i32, i32) {
    %c0_i32 = arith.constant 0 : i32
    %c0_i32_0 = arith.constant 0 : i32
    %c0_i32_1 = arith.constant 0 : i32
    return %c0_i32, %c0_i32_0 : i32, i32
  }
  func.func @transform_4(%arg0: i32) -> (i32, i32) {
    %c0_i32 = arith.constant 0 : i32
    %c0_i32_0 = arith.constant 0 : i32
    %c0_i32_1 = arith.constant 0 : i32
    return %c0_i32, %c0_i32_0 : i32, i32
  }
  func.func @transform_5(%arg0: i32) -> (i32, i32) {
    %c0_i32 = arith.constant 0 : i32
    %c0_i32_0 = arith.constant 0 : i32
    %c0_i32_1 = arith.constant 0 : i32
    return %c0_i32, %c0_i32_0 : i32, i32
  }
  func.func @transform_6(%arg0: i32) -> (i32, i32) {
    %c0_i32 = arith.constant 0 : i32
    %c0_i32_0 = arith.constant 0 : i32
    %c0_i32_1 = arith.constant 0 : i32
    return %c0_i32, %c0_i32_0 : i32, i32
  }
  func.func @transform_7(%arg0: i32) -> (i32, i32) {
    %c0_i32 = arith.constant 0 : i32
    %c0_i32_0 = arith.constant 0 : i32
    return %c0_i32, %arg0 : i32, i32
  }
}

</mosaic_0001>

<bundles_post_ra>
// kernel: learner_forward.1
= control target key start
LH: loop header
LB: loop body
LE: loop exit
PB: predicated region body
PF: predicated region fallthrough
CT: control target
= control target key end

     0   :  { %s3498_s0 = inlined_call_operand.vmem [shape: f32[16,1024], index: 0, kind: input, shape index: {}]   ;;  %s3499_s1 = inlined_call_operand.hbm [shape: bf16[1024,512], index: 1, kind: input, shape index: {}]   ;;  %s3500_s2 = inlined_call_operand.vmem [shape: f32[1,512], index: 2, kind: input, shape index: {}]   ;;  %s3501_s3 = inlined_call_operand.vmem [shape: bf16[512,32], index: 3, kind: input, shape index: {}]   ;;  %s3502_s4 = inlined_call_operand.vmem [shape: f32[1,32], index: 4, kind: input, shape index: {}]   ;;  %s3503_s5 = inlined_call_operand.vmem [shape: bf16[1,32], index: 5, kind: input, shape index: {}]   ;;  %s3504_s6 = inlined_call_operand.<no memory space> [shape: f32[1,1], index: 6, kind: input, shape index: {}]   ;;  %s3505_s7 = inlined_call_operand.hbm [shape: f32[1,16], index: 7, kind: output, shape index: {}]  }
   0x1   :  { %v12_v0 = vstv %s3504_s6 }
   0x2   :  { %13 = vst [vmem:[#allocation2] sm:$0x1] %v12_v0 }
   0x3   :  { %14 = vsyncpa [#allocation4], 0 }
   0x4   :  { %15 = vsyncpa [#allocation5], 0  ;;  %s3261_s26 = smov [#allocation3]   ;;  %s3213_s30 = scalar_lea.hbm %s3499_s1, 32768 }
   0x5   :  { %s23_s27 = sshll.u32 %s3261_s26, 4  ;;  %p3214_p0 = scmp.ne.s32.totalorder %s3499_s1, %s3213_s30  ;;  %s24_s27 = int_to_ptr.vmem [resolvable:$true] %s23_s27 }
   0x6   :  { %p3217_p1 = scmp.lt.u32.totalorder %s3213_s30, %s3499_s1 }
   0x8   :  { %p3219_p2 = pnand %p3217_p1, %p3214_p0 }
   0xa   :  { %3222 = shalt.err (!%p3219_p2)
}
   0xb   :  { %s3223_s6 = scalar_lea.vmem %s24_s27, 32768  ;;  %p3228_p4 = scmp.lt.s32.totalorder %s24_s27, %s24_s27 }
   0xc   :  { %p3224_p3 = scmp.ne.s32.totalorder %s24_s27, %s3223_s6  ;;  %p3229_p5 = scmp.lt.s32.totalorder %s3223_s6, %s3223_s6 }
   0xe   :  { %p3230_p6 = por %p3229_p5, %p3228_p4 }
  0x10   :  { %p3231_p7 = pnand %p3230_p6, %p3224_p3 }
  0x12   :  { %3234 = shalt.err (!%p3231_p7)
}
  0x13   :  { %s3262_s12 = smov 256   ;;  %s3263_s13 = smov 16  }
  0x14   :  { %29 = dma.hbm_to_vmem [thread:$0]  %s3499_s1, 32768, %s24_s27, [#allocation4], %s3262_s12, %s3262_s12, %s3263_s13  }
  0x15   :  { %3257 = dma.done.wait [#allocation4], 32768  }
  0x16   :  { %3258 = vsyncadd [#allocation4], 4294934528  ;;  %v2793_v1 = vld [vmem:[#allocation3 + $0x4] ss:$16 sps:$4 sm:$0xff]   ;;  %v2795_v2 = vld [vmem:[#allocation3 + $0xc] ss:$16 sps:$4 sm:$0xff]  }
  0x17   :  { %1626 = vmatprep.subr.bf16.mxu0 %v2793_v1  ;;  %v2797_v3 = vld [vmem:[#allocation3] ss:$16 sps:$4 sm:$0xff]   ;;  %v2798_v4 = vld [vmem:[#allocation3 + $0x8] ss:$16 sps:$4 sm:$0xff]   ;;  %1798 = vmatprep.subr.bf16.mxu1 %v2795_v2  ;;  %v2799_v5 = vld [vmem:[#allocation3 + $0x24] ss:$16 sps:$4 sm:$0xff]  }
  0x18   :  { %1627 = vmatpush1.bf16.msra.mxu0 %v2797_v3  ;;  %1799 = vmatpush1.bf16.msra.mxu1 %v2798_v4  ;;  %v2801_v6 = vld [vmem:[#allocation3 + $0x2c] ss:$16 sps:$4 sm:$0xff]   ;;  %v2803_v7 = vld [vmem:[#allocation3 + $0x20] ss:$16 sps:$4 sm:$0xff]   ;;  %v2804_v8 = vld [vmem:[#allocation3 + $0x28] ss:$16 sps:$4 sm:$0xff]  }
  0x19   :  { %1628 = vmatprep.subr.bf16.mxu0 %v2799_v5  ;;  %1800 = vmatprep.subr.bf16.mxu1 %v2801_v6  ;;  %v2805_v9 = vld [vmem:[#allocation3 + $0x44] ss:$16 sps:$4 sm:$0xff]   ;;  %v2807_v10 = vld [vmem:[#allocation3 + $0x4c] ss:$16 sps:$4 sm:$0xff]   ;;  %v2809_v11 = vld [vmem:[#allocation3 + $0x40] ss:$16 sps:$4 sm:$0xff]  }
  0x1a   :  { %v2810_v12 = vld [vmem:[#allocation3 + $0x48] ss:$16 sps:$4 sm:$0xff]   ;;  %v2811_v13 = vld [vmem:[#allocation3 + $0x64] ss:$16 sps:$4 sm:$0xff]   ;;  %v2813_v14 = vld [vmem:[#allocation3 + $0x6c] ss:$16 sps:$4 sm:$0xff]  }
  0x1b   :  { %v2815_v15 = vld [vmem:[#allocation3 + $0x60] ss:$16 sps:$4 sm:$0xff]   ;;  %v2816_v16 = vld [vmem:[#allocation3 + $0x68] ss:$16 sps:$4 sm:$0xff]   ;;  %v2817_v17 = vld [vmem:[#allocation3 + $0x84] ss:$16 sps:$4 sm:$0xff]  }
  0x1c   :  { %1629 = vmatpush1.bf16.msra.mxu0 %v2803_v7  ;;  %1801 = vmatpush1.bf16.msra.mxu1 %v2804_v8  ;;  %v2819_v18 = vld [vmem:[#allocation3 + $0x8c] ss:$16 sps:$4 sm:$0xff]   ;;  %v2821_v19 = vld [vmem:[#allocation3 + $0x80] ss:$16 sps:$4 sm:$0xff]   ;;  %v2822_v20 = vld [vmem:[#allocation3 + $0x88] ss:$16 sps:$4 sm:$0xff]  }
  0x1d   :  { %1630 = vmatprep.subr.bf16.mxu0 %v2805_v9  ;;  %1802 = vmatprep.subr.bf16.mxu1 %v2807_v10  ;;  %v2823_v21 = vld [vmem:[#allocation3 + $0xa4] ss:$16 sps:$4 sm:$0xff]   ;;  %v2825_v22 = vld [vmem:[#allocation3 + $0xac] ss:$16 sps:$4 sm:$0xff]   ;;  %v2827_v23 = vld [vmem:[#allocation3 + $0xa0] ss:$16 sps:$4 sm:$0xff]  }
  0x1e   :  { %v2828_v24 = vld [vmem:[#allocation3 + $0xa8] ss:$16 sps:$4 sm:$0xff]   ;;  %v2829_v25 = vld [vmem:[#allocation3 + $0xc4] ss:$16 sps:$4 sm:$0xff]   ;;  %v2831_v26 = vld [vmem:[#allocation3 + $0xcc] ss:$16 sps:$4 sm:$0xff]  }
  0x1f   :  { %v2833_v27 = vld [vmem:[#allocation3 + $0xc0] ss:$16 sps:$4 sm:$0xff]   ;;  %v2834_v28 = vld [vmem:[#allocation3 + $0xc8] ss:$16 sps:$4 sm:$0xff]   ;;  %v2835_v29 = vld [vmem:[#allocation3 + $0xe4] ss:$16 sps:$4 sm:$0xff]  }
  0x20   :  { %1631 = vmatpush1.bf16.msra.mxu0 %v2809_v11  ;;  %1803 = vmatpush1.bf16.msra.mxu1 %v2810_v12  ;;  %v2837_v30 = vld [vmem:[#allocation3 + $0xec] ss:$16 sps:$4 sm:$0xff]   ;;  %v2839_v31 = vld [vmem:[#allocation3 + $0xe0] ss:$16 sps:$4 sm:$0xff]   ;;  %v2840_v32 = vld [vmem:[#allocation3 + $0xe8] ss:$16 sps:$4 sm:$0xff]  }
  0x21   :  { %1632 = vmatprep.subr.bf16.mxu0 %v2811_v13  ;;  %1804 = vmatprep.subr.bf16.mxu1 %v2813_v14  ;;  %v2841_v33 = vld [vmem:[#allocation3 + $0x104] ss:$16 sps:$4 sm:$0xff]   ;;  %v2843_v34 = vld [vmem:[#allocation3 + $0x10c] ss:$16 sps:$4 sm:$0xff]   ;;  %v2845_v35 = vld [vmem:[#allocation3 + $0x100] ss:$16 sps:$4 sm:$0xff]  }
  0x22   :  { %v2846_v36 = vld [vmem:[#allocation3 + $0x108] ss:$16 sps:$4 sm:$0xff]   ;;  %v2847_v37 = vld [vmem:[#allocation3 + $0x124] ss:$16 sps:$4 sm:$0xff]   ;;  %v2849_v38 = vld [vmem:[#allocation3 + $0x12c] ss:$16 sps:$4 sm:$0xff]  }
  0x23   :  { %v2851_v39 = vld [vmem:[#allocation3 + $0x120] ss:$16 sps:$4 sm:$0xff]   ;;  %v2852_v40 = vld [vmem:[#allocation3 + $0x128] ss:$16 sps:$4 sm:$0xff]   ;;  %v2853_v41 = vld [vmem:[#allocation3 + $0x144] ss:$16 sps:$4 sm:$0xff]  }
  0x24   :  { %1633 = vmatpush1.bf16.msra.mxu0 %v2815_v15  ;;  %1805 = vmatpush1.bf16.msra.mxu1 %v2816_v16  ;;  %v2855_v42 = vld [vmem:[#allocation3 + $0x14c] ss:$16 sps:$4 sm:$0xff]   ;;  %v2857_v43 = vld [vmem:[#allocation3 + $0x140] ss:$16 sps:$4 sm:$0xff]   ;;  %v2858_v44 = vld [vmem:[#allocation3 + $0x148] ss:$16 sps:$4 sm:$0xff]  }
  0x25   :  { %1634 = vmatprep.subr.bf16.mxu0 %v2817_v17  ;;  %1806 = vmatprep.subr.bf16.mxu1 %v2819_v18  ;;  %v2859_v45 = vld [vmem:[#allocation3 + $0x164] ss:$16 sps:$4 sm:$0xff]   ;;  %v2861_v46 = vld [vmem:[#allocation3 + $0x16c] ss:$16 sps:$4 sm:$0xff]   ;;  %v2863_v49 = vld [vmem:[#allocation3 + $0x160] ss:$16 sps:$4 sm:$0xff]  }
  0x26   :  { %v45_v47 = vld [vmem:[%s3498_s0 + $0x8] sm:$0xff]  ;;  %v2869_v54 = vld [vmem:[#allocation3 + $0x180] ss:$16 sps:$4 sm:$0xff]   ;;  %vm3265_vm0 = vmmov 0   ;;  %vm2341_vm1 = vcmask 261120   ;;  %s3267_s12 = smov [#allocation6]  }
  0x27   :  { %v53_v48 = vld [vmem:[%s3498_s0 + $0x48] sm:$0xff]  ;;  %v2875_v58 = vld [vmem:[#allocation3 + $0x1a0] ss:$16 sps:$4 sm:$0xff]   ;;  %s2402_s13 = sshll.u32 %s3267_s12, 4  ;;  %vm2394_vm2 = vcmask 122880   ;;  %s2403_s13 = int_to_ptr.vmem [resolvable:$true] %s2402_s13 }
  0x28   :  { %1635 = vmatpush1.bf16.msra.mxu0 %v2821_v19  ;;  %1807 = vmatpush1.bf16.msra.mxu1 %v2822_v20  ;;  %v2864_v50 = vld [vmem:[#allocation3 + $0x168] ss:$16 sps:$4 sm:$0xff]   ;;  %v61_v51 = vpack.c.bf16 %v53_v48, %v45_v47  ;;  %v2865_v52 = vld [vmem:[#allocation3 + $0x184] ss:$16 sps:$4 sm:$0xff]   ;;  %v2867_v53 = vld [vmem:[#allocation3 + $0x18c] ss:$16 sps:$4 sm:$0xff]   ;;  %p3240_p9 = scmp.lt.s32.totalorder %s2403_s13, %s2403_s13 }
  0x29   :  { %1636 = vmatprep.subr.bf16.mxu0 %v2823_v21  ;;  %1808 = vmatprep.subr.bf16.mxu1 %v2825_v22  ;;  %v2870_v55 = vld [vmem:[#allocation3 + $0x188] ss:$16 sps:$4 sm:$0xff]   ;;  %v2871_v56 = vld [vmem:[#allocation3 + $0x1a4] ss:$16 sps:$4 sm:$0xff]   ;;  %v2873_v57 = vld [vmem:[#allocation3 + $0x1ac] ss:$16 sps:$4 sm:$0xff]  }
  0x2a   :  { %1658 = vmatprep.mubr.bf16.mxu0 %v61_v51  ;;  %1830 = vmatprep.mubr.bf16.mxu1 %v61_v51  ;;  %v2876_v59 = vld [vmem:[#allocation3 + $0x1a8] ss:$16 sps:$4 sm:$0xff]   ;;  %v2877_v60 = vld [vmem:[#allocation3 + $0x1c4] ss:$16 sps:$4 sm:$0xff]   ;;  %v2879_v61 = vld [vmem:[#allocation3 + $0x1cc] ss:$16 sps:$4 sm:$0xff]  }
  0x2b   :  { %v2881_v62 = vld [vmem:[#allocation3 + $0x1c0] ss:$16 sps:$4 sm:$0xff]   ;;  %v2882_v63 = vld [vmem:[#allocation3 + $0x1c8] ss:$16 sps:$4 sm:$0xff]   ;;  %v2883_v0 = vld [vmem:[#allocation3 + $0x1e4] ss:$16 sps:$4 sm:$0xff]  }
  0x2c   :  { %1637 = vmatpush1.bf16.msra.mxu0 %v2827_v23  ;;  %1809 = vmatpush1.bf16.msra.mxu1 %v2828_v24  ;;  %v2885_v1 = vld [vmem:[#allocation3 + $0x1ec] ss:$16 sps:$4 sm:$0xff]   ;;  %v2887_v2 = vld [vmem:[#allocation3 + $0x1e0] ss:$16 sps:$4 sm:$0xff]   ;;  %v2888_v3 = vld [vmem:[#allocation3 + $0x1e8] ss:$16 sps:$4 sm:$0xff]  }
  0x2d   :  { %1638 = vmatprep.subr.bf16.mxu0 %v2829_v25  ;;  %1810 = vmatprep.subr.bf16.mxu1 %v2831_v26  ;;  %v2891_v4 = vld [vmem:[#allocation3 + $0x204] ss:$16 sps:$4 sm:$0xff]   ;;  %v2894_v7 = vld [vmem:[#allocation3 + $0x20c] ss:$16 sps:$4 sm:$0xff]   ;;  %v2889_v8 = vld [vmem:[#allocation3 + $0x200] ss:$16 sps:$4 sm:$0xff]  }
  0x2e   :  { %v44_v5 = vld [vmem:[%s3498_s0] sm:$0xff]  ;;  %v2892_v9 = vld [vmem:[#allocation3 + $0x208] ss:$16 sps:$4 sm:$0xff]   ;;  %s3239_s14 = scalar_lea.vmem %s2403_s13, 32 }
  0x2f   :  { %v52_v6 = vld [vmem:[%s3498_s0 + $0x40] sm:$0xff]  ;;  %v2898_v14 = vld [vmem:[#allocation3 + $0x228] ss:$16 sps:$4 sm:$0xff]  }
  0x30   :  { %1639 = vmatpush1.bf16.msra.mxu0 %v2833_v27  ;;  %1811 = vmatpush1.bf16.msra.mxu1 %v2834_v28  ;;  %v60_v10 = vpack.c.bf16 %v52_v6, %v44_v5  ;;  %v2897_v11 = vld [vmem:[#allocation3 + $0x224] ss:$16 sps:$4 sm:$0xff]   ;;  %v2900_v12 = vld [vmem:[#allocation3 + $0x22c] ss:$16 sps:$4 sm:$0xff]   ;;  %v2895_v13 = vld [vmem:[#allocation3 + $0x220] ss:$16 sps:$4 sm:$0xff]  }
  0x31   :  { %1640 = vmatprep.subr.bf16.mxu0 %v2835_v29  ;;  %1812 = vmatprep.subr.bf16.mxu1 %v2837_v30  ;;  %v2903_v15 = vld [vmem:[#allocation3 + $0x244] ss:$16 sps:$4 sm:$0xff]   ;;  %v2906_v16 = vld [vmem:[#allocation3 + $0x24c] ss:$16 sps:$4 sm:$0xff]   ;;  %v2901_v17 = vld [vmem:[#allocation3 + $0x240] ss:$16 sps:$4 sm:$0xff]  }
  0x32   :  { %v2904_v18 = vld [vmem:[#allocation3 + $0x248] ss:$16 sps:$4 sm:$0xff]   ;;  %v2909_v19 = vld [vmem:[#allocation3 + $0x264] ss:$16 sps:$4 sm:$0xff]   ;;  %v2912_v20 = vld [vmem:[#allocation3 + $0x26c] ss:$16 sps:$4 sm:$0xff]  }
  0x33   :  { %v2907_v21 = vld [vmem:[#allocation3 + $0x260] ss:$16 sps:$4 sm:$0xff]   ;;  %v2910_v22 = vld [vmem:[#allocation3 + $0x268] ss:$16 sps:$4 sm:$0xff]   ;;  %v2915_v23 = vld [vmem:[#allocation3 + $0x284] ss:$16 sps:$4 sm:$0xff]  }
  0x34   :  { %1641 = vmatpush1.bf16.msra.mxu0 %v2839_v31  ;;  %1813 = vmatpush1.bf16.msra.mxu1 %v2840_v32  ;;  %v2918_v24 = vld [vmem:[#allocation3 + $0x28c] ss:$16 sps:$4 sm:$0xff]   ;;  %v2913_v25 = vld [vmem:[#allocation3 + $0x280] ss:$16 sps:$4 sm:$0xff]   ;;  %v2916_v26 = vld [vmem:[#allocation3 + $0x288] ss:$16 sps:$4 sm:$0xff]  }
  0x35   :  { %1642 = vmatprep.subr.bf16.mxu0 %v2841_v33  ;;  %1814 = vmatprep.subr.bf16.mxu1 %v2843_v34  ;;  %v2921_v27 = vld [vmem:[#allocation3 + $0x2a4] ss:$16 sps:$4 sm:$0xff]   ;;  %v2924_v28 = vld [vmem:[#allocation3 + $0x2ac] ss:$16 sps:$4 sm:$0xff]   ;;  %v2919_v29 = vld [vmem:[#allocation3 + $0x2a0] ss:$16 sps:$4 sm:$0xff]  }
  0x36   :  { %v2922_v30 = vld [vmem:[#allocation3 + $0x2a8] ss:$16 sps:$4 sm:$0xff]   ;;  %v2927_v31 = vld [vmem:[#allocation3 + $0x2c4] ss:$16 sps:$4 sm:$0xff]   ;;  %v2930_v32 = vld [vmem:[#allocation3 + $0x2cc] ss:$16 sps:$4 sm:$0xff]  }
  0x37   :  { %v47_v33 = vld [vmem:[%s3498_s0 + $0x18] sm:$0xff]  ;;  %v2943_v48 = vld [vmem:[#allocation3 + $0x320] ss:$16 sps:$4 sm:$0xff]  }
  0x38   :  { %1643 = vmatpush1.bf16.msra.mxu0 %v2845_v35  ;;  %1815 = vmatpush1.bf16.msra.mxu1 %v2846_v36  ;;  %v55_v34 = vld [vmem:[%s3498_s0 + $0x58] sm:$0xff]  ;;  %v2925_v35 = vld [vmem:[#allocation3 + $0x2c0] ss:$16 sps:$4 sm:$0xff]  }
  0x39   :  { %1644 = vmatprep.subr.bf16.mxu0 %v2847_v37  ;;  %1816 = vmatprep.subr.bf16.mxu1 %v2849_v38  ;;  %v2928_v36 = vld [vmem:[#allocation3 + $0x2c8] ss:$16 sps:$4 sm:$0xff]   ;;  %v63_v37 = vpack.c.bf16 %v55_v34, %v47_v33  ;;  %v2933_v38 = vld [vmem:[#allocation3 + $0x2e4] ss:$16 sps:$4 sm:$0xff]   ;;  %v2948_v47 = vld [vmem:[#allocation3 + $0x32c] ss:$16 sps:$4 sm:$0xff]  }
  0x3a   :  { %v2954_v51 = vld [vmem:[#allocation3 + $0x34c] ss:$16 sps:$4 sm:$0xff]   ;;  %v2976_v5 = vld [vmem:[#allocation3 + $0x3c8] ss:$16 sps:$4 sm:$0xff]   ;;  %v2981_v6 = vld [vmem:[#allocation3 + $0x3e4] ss:$16 sps:$4 sm:$0xff]  }
  0x3b   :  { %v3014_v33 = vld [vmem:[#allocation3 + $0x48c] ss:$16 sps:$4 sm:$0xff]   ;;  %v3009_v34 = vld [vmem:[#allocation3 + $0x480] ss:$16 sps:$4 sm:$0xff]  }
  0x3c   :  { %1645 = vmatpush1.bf16.msra.mxu0 %v2851_v39  ;;  %1817 = vmatpush1.bf16.msra.mxu1 %v2852_v40  ;;  %v2936_v39 = vld [vmem:[#allocation3 + $0x2ec] ss:$16 sps:$4 sm:$0xff]   ;;  %v2931_v40 = vld [vmem:[#allocation3 + $0x2e0] ss:$16 sps:$4 sm:$0xff]  }
  0x3d   :  { %1646 = vmatprep.subr.bf16.mxu0 %v2853_v41  ;;  %1818 = vmatprep.subr.bf16.mxu1 %v2855_v42  ;;  %v2934_v41 = vld [vmem:[#allocation3 + $0x2e8] ss:$16 sps:$4 sm:$0xff]   ;;  %v2939_v42 = vld [vmem:[#allocation3 + $0x304] ss:$16 sps:$4 sm:$0xff]  }
  0x40   :  { %1647 = vmatpush1.bf16.msra.mxu0 %v2857_v43  ;;  %1819 = vmatpush1.bf16.msra.mxu1 %v2858_v44  ;;  %v2942_v43 = vld [vmem:[#allocation3 + $0x30c] ss:$16 sps:$4 sm:$0xff]   ;;  %v2937_v44 = vld [vmem:[#allocation3 + $0x300] ss:$16 sps:$4 sm:$0xff]  }
  0x41   :  { %1648 = vmatprep.subr.bf16.mxu0 %v2859_v45  ;;  %1820 = vmatprep.subr.bf16.mxu1 %v2861_v46  ;;  %v2940_v45 = vld [vmem:[#allocation3 + $0x308] ss:$16 sps:$4 sm:$0xff]   ;;  %v2945_v46 = vld [vmem:[#allocation3 + $0x324] ss:$16 sps:$4 sm:$0xff]  }
  0x44   :  { %1649 = vmatpush1.bf16.msra.mxu0 %v2863_v49  ;;  %1821 = vmatpush1.bf16.msra.mxu1 %v2864_v50  ;;  %v2946_v49 = vld [vmem:[#allocation3 + $0x328] ss:$16 sps:$4 sm:$0xff]   ;;  %v2951_v50 = vld [vmem:[#allocation3 + $0x344] ss:$16 sps:$4 sm:$0xff]  }
  0x45   :  { %1650 = vmatprep.subr.bf16.mxu0 %v2865_v52  ;;  %1822 = vmatprep.subr.bf16.mxu1 %v2867_v53  ;;  %v2949_v52 = vld [vmem:[#allocation3 + $0x340] ss:$16 sps:$4 sm:$0xff]   ;;  %v2952_v53 = vld [vmem:[#allocation3 + $0x348] ss:$16 sps:$4 sm:$0xff]  }
  0x48   :  { %1651 = vmatpush1.bf16.msra.mxu0 %v2869_v54  ;;  %1823 = vmatpush1.bf16.msra.mxu1 %v2870_v55  ;;  %v2957_v54 = vld [vmem:[#allocation3 + $0x364] ss:$16 sps:$4 sm:$0xff]   ;;  %v2960_v55 = vld [vmem:[#allocation3 + $0x36c] ss:$16 sps:$4 sm:$0xff]  }
  0x49   :  { %1652 = vmatprep.subr.bf16.mxu0 %v2871_v56  ;;  %1824 = vmatprep.subr.bf16.mxu1 %v2873_v57  ;;  %v2955_v56 = vld [vmem:[#allocation3 + $0x360] ss:$16 sps:$4 sm:$0xff]   ;;  %v2958_v57 = vld [vmem:[#allocation3 + $0x368] ss:$16 sps:$4 sm:$0xff]  }
  0x4c   :  { %1653 = vmatpush1.bf16.msra.mxu0 %v2875_v58  ;;  %1825 = vmatpush1.bf16.msra.mxu1 %v2876_v59  ;;  %v2963_v58 = vld [vmem:[#allocation3 + $0x384] ss:$16 sps:$4 sm:$0xff]   ;;  %v2966_v59 = vld [vmem:[#allocation3 + $0x38c] ss:$16 sps:$4 sm:$0xff]  }
  0x4d   :  { %1654 = vmatprep.subr.bf16.mxu0 %v2877_v60  ;;  %1826 = vmatprep.subr.bf16.mxu1 %v2879_v61  ;;  %v2961_v60 = vld [vmem:[#allocation3 + $0x380] ss:$16 sps:$4 sm:$0xff]   ;;  %v2964_v61 = vld [vmem:[#allocation3 + $0x388] ss:$16 sps:$4 sm:$0xff]  }
  0x50   :  { %1655 = vmatpush1.bf16.msra.mxu0 %v2881_v62  ;;  %1827 = vmatpush1.bf16.msra.mxu1 %v2882_v63  ;;  %v2969_v62 = vld [vmem:[#allocation3 + $0x3a4] ss:$16 sps:$4 sm:$0xff]   ;;  %v2972_v63 = vld [vmem:[#allocation3 + $0x3ac] ss:$16 sps:$4 sm:$0xff]  }
  0x51   :  { %1656 = vmatprep.subr.bf16.mxu0 %v2883_v0  ;;  %1828 = vmatprep.subr.bf16.mxu1 %v2885_v1  ;;  %v2967_v0 = vld [vmem:[#allocation3 + $0x3a0] ss:$16 sps:$4 sm:$0xff]   ;;  %v2970_v1 = vld [vmem:[#allocation3 + $0x3a8] ss:$16 sps:$4 sm:$0xff]  }
  0x54   :  { %1657 = vmatpush1.bf16.msra.mxu0 %v2887_v2  ;;  %1829 = vmatpush1.bf16.msra.mxu1 %v2888_v3  ;;  %v2975_v2 = vld [vmem:[#allocation3 + $0x3c4] ss:$16 sps:$4 sm:$0xff]   ;;  %v2978_v3 = vld [vmem:[#allocation3 + $0x3cc] ss:$16 sps:$4 sm:$0xff]  }
  0x55   :  { %1669 = vmatprep.subr.bf16.mxu0 %v2891_v4  ;;  %1841 = vmatprep.subr.bf16.mxu1 %v2894_v7  ;;  %v2973_v4 = vld [vmem:[#allocation3 + $0x3c0] ss:$16 sps:$4 sm:$0xff]   ;;  %v2984_v7 = vld [vmem:[#allocation3 + $0x3ec] ss:$16 sps:$4 sm:$0xff]  }
  0x57   :  { %1659 = vmatmul.mubr.bf16.vlgmr.msra.gmra.mrb[0].mxu0 %v60_v10  ;;  %1831 = vmatmul.mubr.bf16.vlgmr.msra.gmra.mrb[0].mxu1 %v60_v10  ;;  %v2987_v10 = vld [vmem:[#allocation3 + $0x404] ss:$16 sps:$4 sm:$0xff]  }
  0x58   :  { %1670 = vmatpush1.bf16.msra.mxu0 %v2889_v8  ;;  %1842 = vmatpush1.bf16.msra.mxu1 %v2892_v9  ;;  %v2979_v8 = vld [vmem:[#allocation3 + $0x3e0] ss:$16 sps:$4 sm:$0xff]   ;;  %v2982_v9 = vld [vmem:[#allocation3 + $0x3e8] ss:$16 sps:$4 sm:$0xff]  }
  0x59   :  { %1671 = vmatprep.subr.bf16.mxu0 %v2897_v11  ;;  %1843 = vmatprep.subr.bf16.mxu1 %v2900_v12  ;;  %v46_v11 = vld [vmem:[%s3498_s0 + $0x10] sm:$0xff] }
  0x5a   :  { %1701 = vmatprep.mubr.bf16.mxu0 %v63_v37  ;;  %1873 = vmatprep.mubr.bf16.mxu1 %v63_v37  ;;  %v54_v12 = vld [vmem:[%s3498_s0 + $0x50] sm:$0xff] }
  0x5b   :  { %v3020_v37 = vld [vmem:[#allocation3 + $0x4ac] ss:$16 sps:$4 sm:$0xff]  }
  0x5c   :  { %1672 = vmatpush1.bf16.msra.mxu0 %v2895_v13  ;;  %1844 = vmatpush1.bf16.msra.mxu1 %v2898_v14  ;;  %v2990_v13 = vld [vmem:[#allocation3 + $0x40c] ss:$16 sps:$4 sm:$0xff]   ;;  %v2985_v14 = vld [vmem:[#allocation3 + $0x400] ss:$16 sps:$4 sm:$0xff]  }
  0x5d   :  { %1673 = vmatprep.subr.bf16.mxu0 %v2903_v15  ;;  %1845 = vmatprep.subr.bf16.mxu1 %v2906_v16  ;;  %v2988_v15 = vld [vmem:[#allocation3 + $0x408] ss:$16 sps:$4 sm:$0xff]   ;;  %v62_v16 = vpack.c.bf16 %v54_v12, %v46_v11  ;;  %v3077_v12 = vld [vmem:[#allocation3 + $0x5e4] ss:$16 sps:$4 sm:$0xff]  }
  0x5e   :  { %v3072_v11 = vld [vmem:[#allocation3 + $0x5c8] ss:$16 sps:$4 sm:$0xff]  }
  0x60   :  { %1674 = vmatpush1.bf16.msra.mxu0 %v2901_v17  ;;  %1846 = vmatpush1.bf16.msra.mxu1 %v2904_v18  ;;  %v2993_v17 = vld [vmem:[#allocation3 + $0x424] ss:$16 sps:$4 sm:$0xff]   ;;  %v2996_v18 = vld [vmem:[#allocation3 + $0x42c] ss:$16 sps:$4 sm:$0xff]  }
  0x61   :  { %1675 = vmatprep.subr.bf16.mxu0 %v2909_v19  ;;  %1847 = vmatprep.subr.bf16.mxu1 %v2912_v20  ;;  %v49_v19 = vld [vmem:[%s3498_s0 + $0x28] sm:$0xff] }
  0x62   :  { %v57_v20 = vld [vmem:[%s3498_s0 + $0x68] sm:$0xff] }
  0x64   :  { %1676 = vmatpush1.bf16.msra.mxu0 %v2907_v21  ;;  %1848 = vmatpush1.bf16.msra.mxu1 %v2910_v22  ;;  %v2991_v21 = vld [vmem:[#allocation3 + $0x420] ss:$16 sps:$4 sm:$0xff]   ;;  %v2994_v22 = vld [vmem:[#allocation3 + $0x428] ss:$16 sps:$4 sm:$0xff]  }
  0x65   :  { %1677 = vmatprep.subr.bf16.mxu0 %v2915_v23  ;;  %1849 = vmatprep.subr.bf16.mxu1 %v2918_v24  ;;  %v65_v23 = vpack.c.bf16 %v57_v20, %v49_v19  ;;  %v2999_v24 = vld [vmem:[#allocation3 + $0x444] ss:$16 sps:$4 sm:$0xff]   ;;  %v3086_v19 = vld [vmem:[#allocation3 + $0x60c] ss:$16 sps:$4 sm:$0xff]   ;;  %v3081_v20 = vld [vmem:[#allocation3 + $0x600] ss:$16 sps:$4 sm:$0xff]  }
  0x68   :  { %1678 = vmatpush1.bf16.msra.mxu0 %v2913_v25  ;;  %1850 = vmatpush1.bf16.msra.mxu1 %v2916_v26  ;;  %v3002_v25 = vld [vmem:[#allocation3 + $0x44c] ss:$16 sps:$4 sm:$0xff]   ;;  %v2997_v26 = vld [vmem:[#allocation3 + $0x440] ss:$16 sps:$4 sm:$0xff]  }
  0x69   :  { %1679 = vmatprep.subr.bf16.mxu0 %v2921_v27  ;;  %1851 = vmatprep.subr.bf16.mxu1 %v2924_v28  ;;  %v3000_v27 = vld [vmem:[#allocation3 + $0x448] ss:$16 sps:$4 sm:$0xff]   ;;  %v3005_v28 = vld [vmem:[#allocation3 + $0x464] ss:$16 sps:$4 sm:$0xff]  }
  0x6c   :  { %1680 = vmatpush1.bf16.msra.mxu0 %v2919_v29  ;;  %1852 = vmatpush1.bf16.msra.mxu1 %v2922_v30  ;;  %v3008_v29 = vld [vmem:[#allocation3 + $0x46c] ss:$16 sps:$4 sm:$0xff]   ;;  %v3003_v30 = vld [vmem:[#allocation3 + $0x460] ss:$16 sps:$4 sm:$0xff]  }
  0x6d   :  { %1681 = vmatprep.subr.bf16.mxu0 %v2927_v31  ;;  %1853 = vmatprep.subr.bf16.mxu1 %v2930_v32  ;;  %v3006_v31 = vld [vmem:[#allocation3 + $0x468] ss:$16 sps:$4 sm:$0xff]   ;;  %v3011_v32 = vld [vmem:[#allocation3 + $0x484] ss:$16 sps:$4 sm:$0xff]  }
  0x70   :  { %1682 = vmatpush1.bf16.msra.mxu0 %v2925_v35  ;;  %1854 = vmatpush1.bf16.msra.mxu1 %v2928_v36  ;;  %v3012_v35 = vld [vmem:[#allocation3 + $0x488] ss:$16 sps:$4 sm:$0xff]   ;;  %v3017_v36 = vld [vmem:[#allocation3 + $0x4a4] ss:$16 sps:$4 sm:$0xff]  }
  0x71   :  { %1683 = vmatprep.subr.bf16.mxu0 %v2933_v38  ;;  %1855 = vmatprep.subr.bf16.mxu1 %v2936_v39  ;;  %v3015_v38 = vld [vmem:[#allocation3 + $0x4a0] ss:$16 sps:$4 sm:$0xff]   ;;  %v3018_v39 = vld [vmem:[#allocation3 + $0x4a8] ss:$16 sps:$4 sm:$0xff]  }
  0x74   :  { %1684 = vmatpush1.bf16.msra.mxu0 %v2931_v40  ;;  %1856 = vmatpush1.bf16.msra.mxu1 %v2934_v41  ;;  %v3023_v40 = vld [vmem:[#allocation3 + $0x4c4] ss:$16 sps:$4 sm:$0xff]   ;;  %v3026_v41 = vld [vmem:[#allocation3 + $0x4cc] ss:$16 sps:$4 sm:$0xff]  }
  0x75   :  { %1685 = vmatprep.subr.bf16.mxu0 %v2939_v42  ;;  %1857 = vmatprep.subr.bf16.mxu1 %v2942_v43  ;;  %v3021_v42 = vld [vmem:[#allocation3 + $0x4c0] ss:$16 sps:$4 sm:$0xff]   ;;  %v3024_v43 = vld [vmem:[#allocation3 + $0x4c8] ss:$16 sps:$4 sm:$0xff]  }
  0x78   :  { %1686 = vmatpush1.bf16.msra.mxu0 %v2937_v44  ;;  %1858 = vmatpush1.bf16.msra.mxu1 %v2940_v45  ;;  %v3029_v44 = vld [vmem:[#allocation3 + $0x4e4] ss:$16 sps:$4 sm:$0xff]   ;;  %v3032_v45 = vld [vmem:[#allocation3 + $0x4ec] ss:$16 sps:$4 sm:$0xff]  }
  0x79   :  { %1687 = vmatprep.subr.bf16.mxu0 %v2945_v46  ;;  %1859 = vmatprep.subr.bf16.mxu1 %v2948_v47  ;;  %v3027_v46 = vld [vmem:[#allocation3 + $0x4e0] ss:$16 sps:$4 sm:$0xff]   ;;  %v3030_v47 = vld [vmem:[#allocation3 + $0x4e8] ss:$16 sps:$4 sm:$0xff]  }
  0x7c   :  { %1688 = vmatpush1.bf16.msra.mxu0 %v2943_v48  ;;  %1860 = vmatpush1.bf16.msra.mxu1 %v2946_v49  ;;  %v3035_v48 = vld [vmem:[#allocation3 + $0x504] ss:$16 sps:$4 sm:$0xff]   ;;  %v3038_v49 = vld [vmem:[#allocation3 + $0x50c] ss:$16 sps:$4 sm:$0xff]  }
  0x7d   :  { %1689 = vmatprep.subr.bf16.mxu0 %v2951_v50  ;;  %1861 = vmatprep.subr.bf16.mxu1 %v2954_v51  ;;  %v3033_v50 = vld [vmem:[#allocation3 + $0x500] ss:$16 sps:$4 sm:$0xff]   ;;  %v3036_v51 = vld [vmem:[#allocation3 + $0x508] ss:$16 sps:$4 sm:$0xff]  }
  0x80   :  { %1690 = vmatpush1.bf16.msra.mxu0 %v2949_v52  ;;  %1862 = vmatpush1.bf16.msra.mxu1 %v2952_v53  ;;  %v3041_v52 = vld [vmem:[#allocation3 + $0x524] ss:$16 sps:$4 sm:$0xff]   ;;  %v3044_v53 = vld [vmem:[#allocation3 + $0x52c] ss:$16 sps:$4 sm:$0xff]  }
  0x81   :  { %1691 = vmatprep.subr.bf16.mxu0 %v2957_v54  ;;  %1863 = vmatprep.subr.bf16.mxu1 %v2960_v55  ;;  %v3039_v54 = vld [vmem:[#allocation3 + $0x520] ss:$16 sps:$4 sm:$0xff]   ;;  %v3042_v55 = vld [vmem:[#allocation3 + $0x528] ss:$16 sps:$4 sm:$0xff]  }
  0x84   :  { %1692 = vmatpush1.bf16.msra.mxu0 %v2955_v56  ;;  %1864 = vmatpush1.bf16.msra.mxu1 %v2958_v57  ;;  %v3047_v56 = vld [vmem:[#allocation3 + $0x544] ss:$16 sps:$4 sm:$0xff]   ;;  %v3050_v57 = vld [vmem:[#allocation3 + $0x54c] ss:$16 sps:$4 sm:$0xff]  }
  0x85   :  { %1693 = vmatprep.subr.bf16.mxu0 %v2963_v58  ;;  %1865 = vmatprep.subr.bf16.mxu1 %v2966_v59  ;;  %v3045_v58 = vld [vmem:[#allocation3 + $0x540] ss:$16 sps:$4 sm:$0xff]   ;;  %v3048_v59 = vld [vmem:[#allocation3 + $0x548] ss:$16 sps:$4 sm:$0xff]  }
  0x88   :  { %1694 = vmatpush1.bf16.msra.mxu0 %v2961_v60  ;;  %1866 = vmatpush1.bf16.msra.mxu1 %v2964_v61  ;;  %v3053_v60 = vld [vmem:[#allocation3 + $0x564] ss:$16 sps:$4 sm:$0xff]   ;;  %v3056_v61 = vld [vmem:[#allocation3 + $0x56c] ss:$16 sps:$4 sm:$0xff]  }
  0x89   :  { %1695 = vmatprep.subr.bf16.mxu0 %v2969_v62  ;;  %1867 = vmatprep.subr.bf16.mxu1 %v2972_v63  ;;  %v3051_v62 = vld [vmem:[#allocation3 + $0x560] ss:$16 sps:$4 sm:$0xff]   ;;  %v3054_v63 = vld [vmem:[#allocation3 + $0x568] ss:$16 sps:$4 sm:$0xff]  }
  0x8c   :  { %1696 = vmatpush1.bf16.msra.mxu0 %v2967_v0  ;;  %1868 = vmatpush1.bf16.msra.mxu1 %v2970_v1  ;;  %v3059_v0 = vld [vmem:[#allocation3 + $0x584] ss:$16 sps:$4 sm:$0xff]   ;;  %v3062_v1 = vld [vmem:[#allocation3 + $0x58c] ss:$16 sps:$4 sm:$0xff]  }
  0x8d   :  { %1697 = vmatprep.subr.bf16.mxu0 %v2975_v2  ;;  %1869 = vmatprep.subr.bf16.mxu1 %v2978_v3  ;;  %v3057_v2 = vld [vmem:[#allocation3 + $0x580] ss:$16 sps:$4 sm:$0xff]   ;;  %v3060_v3 = vld [vmem:[#allocation3 + $0x588] ss:$16 sps:$4 sm:$0xff]  }
  0x90   :  { %1698 = vmatpush1.bf16.msra.mxu0 %v2973_v4  ;;  %1870 = vmatpush1.bf16.msra.mxu1 %v2976_v5  ;;  %v3065_v4 = vld [vmem:[#allocation3 + $0x5a4] ss:$16 sps:$4 sm:$0xff]   ;;  %v3068_v5 = vld [vmem:[#allocation3 + $0x5ac] ss:$16 sps:$4 sm:$0xff]  }
  0x91   :  { %1699 = vmatprep.subr.bf16.mxu0 %v2981_v6  ;;  %1871 = vmatprep.subr.bf16.mxu1 %v2984_v7  ;;  %v3063_v6 = vld [vmem:[#allocation3 + $0x5a0] ss:$16 sps:$4 sm:$0xff]   ;;  %v3066_v7 = vld [vmem:[#allocation3 + $0x5a8] ss:$16 sps:$4 sm:$0xff]  }
  0x94   :  { %1700 = vmatpush1.bf16.msra.mxu0 %v2979_v8  ;;  %1872 = vmatpush1.bf16.msra.mxu1 %v2982_v9  ;;  %v3071_v8 = vld [vmem:[#allocation3 + $0x5c4] ss:$16 sps:$4 sm:$0xff]   ;;  %v3074_v9 = vld [vmem:[#allocation3 + $0x5cc] ss:$16 sps:$4 sm:$0xff]  }
  0x95   :  { %1712 = vmatprep.subr.bf16.mxu0 %v2987_v10  ;;  %1884 = vmatprep.subr.bf16.mxu1 %v2990_v13  ;;  %v3069_v10 = vld [vmem:[#allocation3 + $0x5c0] ss:$16 sps:$4 sm:$0xff]   ;;  %v3080_v13 = vld [vmem:[#allocation3 + $0x5ec] ss:$16 sps:$4 sm:$0xff]  }
  0x97   :  { %1702 = vmatmul.mubr.bf16.vlgmr.msra.gmra.mrb[0].mxu0 %v62_v16  ;;  %1874 = vmatmul.mubr.bf16.vlgmr.msra.gmra.mrb[0].mxu1 %v62_v16  ;;  %v3083_v16 = vld [vmem:[#allocation3 + $0x604] ss:$16 sps:$4 sm:$0xff]  }
  0x98   :  { %1713 = vmatpush1.bf16.msra.mxu0 %v2985_v14  ;;  %1885 = vmatpush1.bf16.msra.mxu1 %v2988_v15  ;;  %v3075_v14 = vld [vmem:[#allocation3 + $0x5e0] ss:$16 sps:$4 sm:$0xff]   ;;  %v3078_v15 = vld [vmem:[#allocation3 + $0x5e8] ss:$16 sps:$4 sm:$0xff]  }
  0x99   :  { %1714 = vmatprep.subr.bf16.mxu0 %v2993_v17  ;;  %1886 = vmatprep.subr.bf16.mxu1 %v2996_v18  ;;  %v48_v17 = vld [vmem:[%s3498_s0 + $0x20] sm:$0xff] }
  0x9a   :  { %1744 = vmatprep.mubr.bf16.mxu0 %v65_v23  ;;  %1916 = vmatprep.mubr.bf16.mxu1 %v65_v23  ;;  %v56_v18 = vld [vmem:[%s3498_s0 + $0x60] sm:$0xff] }
  0x9b   :  { %v64_v23 = vpack.c.bf16 %v56_v18, %v48_v17  ;;  %v3168_v17 = vld [vmem:[#allocation3 + $0x7c8] ss:$16 sps:$4 sm:$0xff]   ;;  %v3173_v18 = vld [vmem:[#allocation3 + $0x7e4] ss:$16 sps:$4 sm:$0xff]  }
  0x9c   :  { %1715 = vmatpush1.bf16.msra.mxu0 %v2991_v21  ;;  %1887 = vmatpush1.bf16.msra.mxu1 %v2994_v22  ;;  %v3084_v21 = vld [vmem:[#allocation3 + $0x608] ss:$16 sps:$4 sm:$0xff]  }
  0x9d   :  { %1716 = vmatprep.subr.bf16.mxu0 %v2999_v24  ;;  %1888 = vmatprep.subr.bf16.mxu1 %v3002_v25  ;;  %v51_v22 = vld [vmem:[%s3498_s0 + $0x38] sm:$0xff] }
  0x9e   :  { %v59_v24 = vld [vmem:[%s3498_s0 + $0x78] sm:$0xff] }
  0x9f   :  { %v3089_v25 = vld [vmem:[#allocation3 + $0x624] ss:$16 sps:$4 sm:$0xff]  }
  0xa0   :  { %1717 = vmatpush1.bf16.msra.mxu0 %v2997_v26  ;;  %1889 = vmatpush1.bf16.msra.mxu1 %v3000_v27  ;;  %v3092_v26 = vld [vmem:[#allocation3 + $0x62c] ss:$16 sps:$4 sm:$0xff]   ;;  %v3087_v27 = vld [vmem:[#allocation3 + $0x620] ss:$16 sps:$4 sm:$0xff]  }
  0xa1   :  { %1718 = vmatprep.subr.bf16.mxu0 %v3005_v28  ;;  %1890 = vmatprep.subr.bf16.mxu1 %v3008_v29  ;;  %v67_v28 = vpack.c.bf16 %v59_v24, %v51_v22  ;;  %v3090_v29 = vld [vmem:[#allocation3 + $0x628] ss:$16 sps:$4 sm:$0xff]   ;;  %v50_v22 = vld [vmem:[%s3498_s0 + $0x30] sm:$0xff]  ;;  %v3177_v24 = vld [vmem:[%s3501_s3 + $0x40] sm:$0xff]  }
  0xa4   :  { %1719 = vmatpush1.bf16.msra.mxu0 %v3003_v30  ;;  %1891 = vmatpush1.bf16.msra.mxu1 %v3006_v31  ;;  %v3095_v30 = vld [vmem:[#allocation3 + $0x644] ss:$16 sps:$4 sm:$0xff]   ;;  %v3098_v31 = vld [vmem:[#allocation3 + $0x64c] ss:$16 sps:$4 sm:$0xff]  }
  0xa5   :  { %1720 = vmatprep.subr.bf16.mxu0 %v3011_v32  ;;  %1892 = vmatprep.subr.bf16.mxu1 %v3014_v33  ;;  %v3093_v32 = vld [vmem:[#allocation3 + $0x640] ss:$16 sps:$4 sm:$0xff]   ;;  %v3096_v33 = vld [vmem:[#allocation3 + $0x648] ss:$16 sps:$4 sm:$0xff]  }
  0xa8   :  { %1721 = vmatpush1.bf16.msra.mxu0 %v3009_v34  ;;  %1893 = vmatpush1.bf16.msra.mxu1 %v3012_v35  ;;  %v3101_v34 = vld [vmem:[#allocation3 + $0x664] ss:$16 sps:$4 sm:$0xff]   ;;  %v3104_v35 = vld [vmem:[#allocation3 + $0x66c] ss:$16 sps:$4 sm:$0xff]  }
  0xa9   :  { %1722 = vmatprep.subr.bf16.mxu0 %v3017_v36  ;;  %1894 = vmatprep.subr.bf16.mxu1 %v3020_v37  ;;  %v3099_v36 = vld [vmem:[#allocation3 + $0x660] ss:$16 sps:$4 sm:$0xff]   ;;  %v3102_v37 = vld [vmem:[#allocation3 + $0x668] ss:$16 sps:$4 sm:$0xff]  }
  0xac   :  { %1723 = vmatpush1.bf16.msra.mxu0 %v3015_v38  ;;  %1895 = vmatpush1.bf16.msra.mxu1 %v3018_v39  ;;  %v3107_v38 = vld [vmem:[#allocation3 + $0x684] ss:$16 sps:$4 sm:$0xff]   ;;  %v3110_v39 = vld [vmem:[#allocation3 + $0x68c] ss:$16 sps:$4 sm:$0xff]  }
  0xad   :  { %1724 = vmatprep.subr.bf16.mxu0 %v3023_v40  ;;  %1896 = vmatprep.subr.bf16.mxu1 %v3026_v41  ;;  %v3105_v40 = vld [vmem:[#allocation3 + $0x680] ss:$16 sps:$4 sm:$0xff]   ;;  %v3108_v41 = vld [vmem:[#allocation3 + $0x688] ss:$16 sps:$4 sm:$0xff]  }
  0xb0   :  { %1725 = vmatpush1.bf16.msra.mxu0 %v3021_v42  ;;  %1897 = vmatpush1.bf16.msra.mxu1 %v3024_v43  ;;  %v3113_v42 = vld [vmem:[#allocation3 + $0x6a4] ss:$16 sps:$4 sm:$0xff]   ;;  %v3116_v43 = vld [vmem:[#allocation3 + $0x6ac] ss:$16 sps:$4 sm:$0xff]  }
  0xb1   :  { %1726 = vmatprep.subr.bf16.mxu0 %v3029_v44  ;;  %1898 = vmatprep.subr.bf16.mxu1 %v3032_v45  ;;  %v3111_v44 = vld [vmem:[#allocation3 + $0x6a0] ss:$16 sps:$4 sm:$0xff]   ;;  %v3114_v45 = vld [vmem:[#allocation3 + $0x6a8] ss:$16 sps:$4 sm:$0xff]  }
  0xb4   :  { %1727 = vmatpush1.bf16.msra.mxu0 %v3027_v46  ;;  %1899 = vmatpush1.bf16.msra.mxu1 %v3030_v47  ;;  %v3119_v46 = vld [vmem:[#allocation3 + $0x6c4] ss:$16 sps:$4 sm:$0xff]   ;;  %v3122_v47 = vld [vmem:[#allocation3 + $0x6cc] ss:$16 sps:$4 sm:$0xff]  }
  0xb5   :  { %1728 = vmatprep.subr.bf16.mxu0 %v3035_v48  ;;  %1900 = vmatprep.subr.bf16.mxu1 %v3038_v49  ;;  %v3117_v48 = vld [vmem:[#allocation3 + $0x6c0] ss:$16 sps:$4 sm:$0xff]   ;;  %v3120_v49 = vld [vmem:[#allocation3 + $0x6c8] ss:$16 sps:$4 sm:$0xff]  }
  0xb8   :  { %1729 = vmatpush1.bf16.msra.mxu0 %v3033_v50  ;;  %1901 = vmatpush1.bf16.msra.mxu1 %v3036_v51  ;;  %v3125_v50 = vld [vmem:[#allocation3 + $0x6e4] ss:$16 sps:$4 sm:$0xff]   ;;  %v3128_v51 = vld [vmem:[#allocation3 + $0x6ec] ss:$16 sps:$4 sm:$0xff]  }
  0xb9   :  { %1730 = vmatprep.subr.bf16.mxu0 %v3041_v52  ;;  %1902 = vmatprep.subr.bf16.mxu1 %v3044_v53  ;;  %v3123_v52 = vld [vmem:[#allocation3 + $0x6e0] ss:$16 sps:$4 sm:$0xff]   ;;  %v3126_v53 = vld [vmem:[#allocation3 + $0x6e8] ss:$16 sps:$4 sm:$0xff]  }
  0xbc   :  { %1731 = vmatpush1.bf16.msra.mxu0 %v3039_v54  ;;  %1903 = vmatpush1.bf16.msra.mxu1 %v3042_v55  ;;  %v3131_v54 = vld [vmem:[#allocation3 + $0x704] ss:$16 sps:$4 sm:$0xff]   ;;  %v3134_v55 = vld [vmem:[#allocation3 + $0x70c] ss:$16 sps:$4 sm:$0xff]  }
  0xbd   :  { %1732 = vmatprep.subr.bf16.mxu0 %v3047_v56  ;;  %1904 = vmatprep.subr.bf16.mxu1 %v3050_v57  ;;  %v3129_v56 = vld [vmem:[#allocation3 + $0x700] ss:$16 sps:$4 sm:$0xff]   ;;  %v3132_v57 = vld [vmem:[#allocation3 + $0x708] ss:$16 sps:$4 sm:$0xff]  }
  0xc0   :  { %1733 = vmatpush1.bf16.msra.mxu0 %v3045_v58  ;;  %1905 = vmatpush1.bf16.msra.mxu1 %v3048_v59  ;;  %v3137_v58 = vld [vmem:[#allocation3 + $0x724] ss:$16 sps:$4 sm:$0xff]   ;;  %v3140_v59 = vld [vmem:[#allocation3 + $0x72c] ss:$16 sps:$4 sm:$0xff]  }
  0xc1   :  { %1734 = vmatprep.subr.bf16.mxu0 %v3053_v60  ;;  %1906 = vmatprep.subr.bf16.mxu1 %v3056_v61  ;;  %v3135_v60 = vld [vmem:[#allocation3 + $0x720] ss:$16 sps:$4 sm:$0xff]   ;;  %v3138_v61 = vld [vmem:[#allocation3 + $0x728] ss:$16 sps:$4 sm:$0xff]  }
  0xc4   :  { %1735 = vmatpush1.bf16.msra.mxu0 %v3051_v62  ;;  %1907 = vmatpush1.bf16.msra.mxu1 %v3054_v63  ;;  %v3143_v62 = vld [vmem:[#allocation3 + $0x744] ss:$16 sps:$4 sm:$0xff]   ;;  %v3146_v63 = vld [vmem:[#allocation3 + $0x74c] ss:$16 sps:$4 sm:$0xff]  }
  0xc5   :  { %1736 = vmatprep.subr.bf16.mxu0 %v3059_v0  ;;  %1908 = vmatprep.subr.bf16.mxu1 %v3062_v1  ;;  %v3141_v0 = vld [vmem:[#allocation3 + $0x740] ss:$16 sps:$4 sm:$0xff]   ;;  %v3144_v1 = vld [vmem:[#allocation3 + $0x748] ss:$16 sps:$4 sm:$0xff]  }
  0xc8   :  { %1737 = vmatpush1.bf16.msra.mxu0 %v3057_v2  ;;  %1909 = vmatpush1.bf16.msra.mxu1 %v3060_v3  ;;  %v3149_v2 = vld [vmem:[#allocation3 + $0x764] ss:$16 sps:$4 sm:$0xff]   ;;  %v3152_v3 = vld [vmem:[#allocation3 + $0x76c] ss:$16 sps:$4 sm:$0xff]  }
  0xc9   :  { %1738 = vmatprep.subr.bf16.mxu0 %v3065_v4  ;;  %1910 = vmatprep.subr.bf16.mxu1 %v3068_v5  ;;  %v3147_v4 = vld [vmem:[#allocation3 + $0x760] ss:$16 sps:$4 sm:$0xff]   ;;  %v3150_v5 = vld [vmem:[#allocation3 + $0x768] ss:$16 sps:$4 sm:$0xff]  }
  0xcc   :  { %1739 = vmatpush1.bf16.msra.mxu0 %v3063_v6  ;;  %1911 = vmatpush1.bf16.msra.mxu1 %v3066_v7  ;;  %v3155_v6 = vld [vmem:[#allocation3 + $0x784] ss:$16 sps:$4 sm:$0xff]   ;;  %v3158_v7 = vld [vmem:[#allocation3 + $0x78c] ss:$16 sps:$4 sm:$0xff]  }
  0xcd   :  { %1740 = vmatprep.subr.bf16.mxu0 %v3071_v8  ;;  %1912 = vmatprep.subr.bf16.mxu1 %v3074_v9  ;;  %v3153_v8 = vld [vmem:[#allocation3 + $0x780] ss:$16 sps:$4 sm:$0xff]   ;;  %v3156_v9 = vld [vmem:[#allocation3 + $0x788] ss:$16 sps:$4 sm:$0xff]  }
  0xd0   :  { %1741 = vmatpush1.bf16.msra.mxu0 %v3069_v10  ;;  %1913 = vmatpush1.bf16.msra.mxu1 %v3072_v11  ;;  %v3161_v10 = vld [vmem:[#allocation3 + $0x7a4] ss:$16 sps:$4 sm:$0xff]   ;;  %v3164_v11 = vld [vmem:[#allocation3 + $0x7ac] ss:$16 sps:$4 sm:$0xff]  }
  0xd1   :  { %1742 = vmatprep.subr.bf16.mxu0 %v3077_v12  ;;  %1914 = vmatprep.subr.bf16.mxu1 %v3080_v13  ;;  %v3159_v12 = vld [vmem:[#allocation3 + $0x7a0] ss:$16 sps:$4 sm:$0xff]   ;;  %v3162_v13 = vld [vmem:[#allocation3 + $0x7a8] ss:$16 sps:$4 sm:$0xff]  }
  0xd4   :  { %1743 = vmatpush1.bf16.msra.mxu0 %v3075_v14  ;;  %1915 = vmatpush1.bf16.msra.mxu1 %v3078_v15  ;;  %v3167_v14 = vld [vmem:[#allocation3 + $0x7c4] ss:$16 sps:$4 sm:$0xff]   ;;  %v3170_v15 = vld [vmem:[#allocation3 + $0x7cc] ss:$16 sps:$4 sm:$0xff]  }
  0xd5   :  { %1755 = vmatprep.subr.bf16.mxu0 %v3083_v16  ;;  %1927 = vmatprep.subr.bf16.mxu1 %v3086_v19  ;;  %v3165_v16 = vld [vmem:[#allocation3 + $0x7c0] ss:$16 sps:$4 sm:$0xff]   ;;  %v3176_v19 = vld [vmem:[#allocation3 + $0x7ec] ss:$16 sps:$4 sm:$0xff]  }
  0xd7   :  { %1745 = vmatmul.mubr.bf16.vlgmr.msra.gmra.mrb[0].mxu0 %v64_v23  ;;  %1917 = vmatmul.mubr.bf16.vlgmr.msra.gmra.mrb[0].mxu1 %v64_v23  ;;  %v58_v23 = vld [vmem:[%s3498_s0 + $0x70] sm:$0xff] }
  0xd8   :  { %1756 = vmatpush1.bf16.msra.mxu0 %v3081_v20  ;;  %1928 = vmatpush1.bf16.msra.mxu1 %v3084_v21  ;;  %v3171_v20 = vld [vmem:[#allocation3 + $0x7e0] ss:$16 sps:$4 sm:$0xff]   ;;  %v3174_v21 = vld [vmem:[#allocation3 + $0x7e8] ss:$16 sps:$4 sm:$0xff]  }
  0xd9   :  { %1757 = vmatprep.subr.bf16.mxu0 %v3089_v25  ;;  %1929 = vmatprep.subr.bf16.mxu1 %v3092_v26  ;;  %v3178_v25 = vld [vmem:[%s3501_s3 + $0xc0] sm:$0xff]   ;;  %v66_v26 = vpack.c.bf16 %v58_v23, %v50_v22 }
  0xda   :  { %1787 = vmatprep.mubr.bf16.mxu0 %v67_v28  ;;  %1959 = vmatprep.mubr.bf16.mxu1 %v67_v28  ;;  %v3180_v28 = vld [vmem:[%s3501_s3 + $0x80] sm:$0xff]  }
  0xdc   :  { %1758 = vmatpush1.bf16.msra.mxu0 %v3087_v27  ;;  %1930 = vmatpush1.bf16.msra.mxu1 %v3090_v29  ;;  %v3179_v27 = vld [vmem:[%s3501_s3] sm:$0xff]   ;;  %v3181_v29 = vld [vmem:[%s3501_s3 + $0x48] sm:$0xff]  }
  0xdd   :  { %1759 = vmatprep.subr.bf16.mxu0 %v3095_v30  ;;  %1931 = vmatprep.subr.bf16.mxu1 %v3098_v31  ;;  %v3182_v30 = vld [vmem:[%s3501_s3 + $0xc8] sm:$0xff]  }
  0xde   :  { %v3183_v31 = vld [vmem:[%s3501_s3 + $0x8] sm:$0xff]  }
  0xe0   :  { %1760 = vmatpush1.bf16.msra.mxu0 %v3093_v32  ;;  %1932 = vmatpush1.bf16.msra.mxu1 %v3096_v33  ;;  %v3184_v32 = vld [vmem:[%s3501_s3 + $0x88] sm:$0xff]   ;;  %v3185_v33 = vld [vmem:[%s3501_s3 + $0x50] sm:$0xff]  }
  0xe1   :  { %1761 = vmatprep.subr.bf16.mxu0 %v3101_v34  ;;  %1933 = vmatprep.subr.bf16.mxu1 %v3104_v35  ;;  %v3186_v34 = vld [vmem:[%s3501_s3 + $0xd0] sm:$0xff]  }
  0xe2   :  { %v3187_v35 = vld [vmem:[%s3501_s3 + $0x10] sm:$0xff]  }
  0xe4   :  { %1762 = vmatpush1.bf16.msra.mxu0 %v3099_v36  ;;  %1934 = vmatpush1.bf16.msra.mxu1 %v3102_v37  ;;  %v3188_v36 = vld [vmem:[%s3501_s3 + $0x90] sm:$0xff]   ;;  %v3189_v37 = vld [vmem:[%s3501_s3 + $0x58] sm:$0xff]  }
  0xe5   :  { %1763 = vmatprep.subr.bf16.mxu0 %v3107_v38  ;;  %1935 = vmatprep.subr.bf16.mxu1 %v3110_v39  ;;  %v3190_v38 = vld [vmem:[%s3501_s3 + $0xd8] sm:$0xff]  }
  0xe6   :  { %v3191_v39 = vld [vmem:[%s3501_s3 + $0x18] sm:$0xff]  }
  0xe8   :  { %1764 = vmatpush1.bf16.msra.mxu0 %v3105_v40  ;;  %1936 = vmatpush1.bf16.msra.mxu1 %v3108_v41  ;;  %v3192_v40 = vld [vmem:[%s3501_s3 + $0x98] sm:$0xff]   ;;  %v3193_v41 = vld [vmem:[%s3501_s3 + $0x60] sm:$0xff]  }
  0xe9   :  { %1765 = vmatprep.subr.bf16.mxu0 %v3113_v42  ;;  %1937 = vmatprep.subr.bf16.mxu1 %v3116_v43  ;;  %v3194_v42 = vld [vmem:[%s3501_s3 + $0xe0] sm:$0xff]  }
  0xea   :  { %v3195_v43 = vld [vmem:[%s3501_s3 + $0x20] sm:$0xff]  }
  0xec   :  { %1766 = vmatpush1.bf16.msra.mxu0 %v3111_v44  ;;  %1938 = vmatpush1.bf16.msra.mxu1 %v3114_v45  ;;  %v3196_v44 = vld [vmem:[%s3501_s3 + $0xa0] sm:$0xff]   ;;  %v3197_v45 = vld [vmem:[%s3501_s3 + $0x68] sm:$0xff]  }
  0xed   :  { %1767 = vmatprep.subr.bf16.mxu0 %v3119_v46  ;;  %1939 = vmatprep.subr.bf16.mxu1 %v3122_v47  ;;  %v3198_v46 = vld [vmem:[%s3501_s3 + $0xe8] sm:$0xff]  }
  0xee   :  { %v3199_v47 = vld [vmem:[%s3501_s3 + $0x28] sm:$0xff]  }
  0xf0   :  { %1768 = vmatpush1.bf16.msra.mxu0 %v3117_v48  ;;  %1940 = vmatpush1.bf16.msra.mxu1 %v3120_v49  ;;  %v3200_v48 = vld [vmem:[%s3501_s3 + $0xa8] sm:$0xff]   ;;  %v3201_v49 = vld [vmem:[%s3501_s3 + $0x70] sm:$0xff]  }
  0xf1   :  { %1769 = vmatprep.subr.bf16.mxu0 %v3125_v50  ;;  %1941 = vmatprep.subr.bf16.mxu1 %v3128_v51  ;;  %v3202_v50 = vld [vmem:[%s3501_s3 + $0xf0] sm:$0xff]  }
  0xf2   :  { %v3203_v51 = vld [vmem:[%s3501_s3 + $0x30] sm:$0xff]  }
  0xf4   :  { %1770 = vmatpush1.bf16.msra.mxu0 %v3123_v52  ;;  %1942 = vmatpush1.bf16.msra.mxu1 %v3126_v53  ;;  %v3204_v52 = vld [vmem:[%s3501_s3 + $0xb0] sm:$0xff]   ;;  %v3205_v53 = vld [vmem:[%s3501_s3 + $0x78] sm:$0xff]  }
  0xf5   :  { %1771 = vmatprep.subr.bf16.mxu0 %v3131_v54  ;;  %1943 = vmatprep.subr.bf16.mxu1 %v3134_v55  ;;  %v3206_v54 = vld [vmem:[%s3501_s3 + $0xf8] sm:$0xff]  }
  0xf6   :  { %v3207_v55 = vld [vmem:[%s3501_s3 + $0x38] sm:$0xff]  }
  0xf8   :  { %1772 = vmatpush1.bf16.msra.mxu0 %v3129_v56  ;;  %1944 = vmatpush1.bf16.msra.mxu1 %v3132_v57  ;;  %v3208_v56 = vld [vmem:[%s3501_s3 + $0xb8] sm:$0xff]   ;;  %v326_v57 = vlaneseq }
  0xf9   :  { %1773 = vmatprep.subr.bf16.mxu0 %v3137_v58  ;;  %1945 = vmatprep.subr.bf16.mxu1 %v3140_v59 }
  0xfa   :  { %v3467_v58 = vshrl.u32 %v326_v57, 7 }
  0xfc   :  { %1774 = vmatpush1.bf16.msra.mxu0 %v3135_v60  ;;  %1946 = vmatpush1.bf16.msra.mxu1 %v3138_v61  ;;  %v328_v59 = vsub.s32 0, %v3467_v58  ;;  %v336_v60 = vsub.s32 2, %v3467_v58  ;;  %v324_v61 = vld [vmem:[%s3500_s2] sm:$0xf] }
  0xfd   :  { %1775 = vmatprep.subr.bf16.mxu0 %v3143_v62  ;;  %1947 = vmatprep.subr.bf16.mxu1 %v3146_v63  ;;  %v332_v62 = vsub.s32 1, %v3467_v58  ;;  %v340_v63 = vsub.s32 3, %v3467_v58 }
 0x100   :  { %1776 = vmatpush1.bf16.msra.mxu0 %v3141_v0  ;;  %1948 = vmatpush1.bf16.msra.mxu1 %v3144_v1  ;;  %v329_v0 = vrot.slane %v324_v61, %v328_v59  ;;  %v337_v1 = vrot.slane %v324_v61, %v336_v60 }
 0x101   :  { %1777 = vmatprep.subr.bf16.mxu0 %v3149_v2  ;;  %1949 = vmatprep.subr.bf16.mxu1 %v3152_v3  ;;  %v333_v2 = vrot.slane %v324_v61, %v332_v62  ;;  %v341_v3 = vrot.slane %v324_v61, %v340_v63 }
 0x104   :  { %1778 = vmatpush1.bf16.msra.mxu0 %v3147_v4  ;;  %1950 = vmatpush1.bf16.msra.mxu1 %v3150_v5 }
 0x105   :  { %1779 = vmatprep.subr.bf16.mxu0 %v3155_v6  ;;  %1951 = vmatprep.subr.bf16.mxu1 %v3158_v7 }
 0x108   :  { %1780 = vmatpush1.bf16.msra.mxu0 %v3153_v8  ;;  %1952 = vmatpush1.bf16.msra.mxu1 %v3156_v9 }
 0x109   :  { %1781 = vmatprep.subr.bf16.mxu0 %v3161_v10  ;;  %1953 = vmatprep.subr.bf16.mxu1 %v3164_v11 }
 0x10c   :  { %1782 = vmatpush1.bf16.msra.mxu0 %v3159_v12  ;;  %1954 = vmatpush1.bf16.msra.mxu1 %v3162_v13 }
 0x10d   :  { %1783 = vmatprep.subr.bf16.mxu0 %v3167_v14  ;;  %1955 = vmatprep.subr.bf16.mxu1 %v3170_v15 }
 0x110   :  { %1784 = vmatpush1.bf16.msra.mxu0 %v3165_v16  ;;  %1956 = vmatpush1.bf16.msra.mxu1 %v3168_v17 }
 0x111   :  { %1785 = vmatprep.subr.bf16.mxu0 %v3173_v18  ;;  %1957 = vmatprep.subr.bf16.mxu1 %v3176_v19 }
 0x114   :  { %1786 = vmatpush1.bf16.msra.mxu0 %v3171_v20  ;;  %1958 = vmatpush1.bf16.msra.mxu1 %v3174_v21 }
 0x115   :  { %2701 = vmatprep.subr.bf16.mxu0 %v3177_v24  ;;  %2723 = vmatprep.subr.bf16.mxu1 %v3178_v25 }
 0x117   :  { %1788 = vmatmul.mubr.bf16.vlgmr.msra.gmra.mrb[0].mxu0 %v66_v26  ;;  %1960 = vmatmul.mubr.bf16.vlgmr.msra.gmra.mrb[0].mxu1 %v66_v26 }
 0x118   :  { %2702 = vmatpush3.bf16.msra.mxu0 %v3179_v27  ;;  %2724 = vmatpush3.bf16.msra.mxu1 %v3180_v28 }
 0x119   :  { %2703 = vmatprep.subr.bf16.mxu0 %v3181_v29  ;;  %2725 = vmatprep.subr.bf16.mxu1 %v3182_v30 }
 0x11c   :  { %2704 = vmatpush3.bf16.msra.mxu0 %v3183_v31  ;;  %2726 = vmatpush3.bf16.msra.mxu1 %v3184_v32  ;;  %v3264_v32 = vmov 0.0  }
 0x11d   :  { %2705 = vmatprep.subr.bf16.mxu0 %v3185_v33  ;;  %2727 = vmatprep.subr.bf16.mxu1 %v3186_v34  ;;  %v2331_v33 = vld [vmem:[#allocation2] sm:$0x1]  ;;  %v3266_v34 = vmov 0  }
 0x11e   :  { %2792 = vset.pattern.permute.xlu0 %v3266_v34 }
 0x11f   :  { %2334 = vperm.xlu0 %2792, %v2331_v33  }
 0x120   :  { %2706 = vmatpush3.bf16.msra.mxu0 %v3187_v35  ;;  %2728 = vmatpush3.bf16.msra.mxu1 %v3188_v36 }
 0x121   :  { %2707 = vmatprep.subr.bf16.mxu0 %v3189_v37  ;;  %2729 = vmatprep.subr.bf16.mxu1 %v3190_v38  ;;  %v2667_v37 = vld [vmem:[%s3502_s4] ss:$0 sm:$0xff] }
 0x124   :  { %2708 = vmatpush3.bf16.msra.mxu0 %v3191_v39  ;;  %2730 = vmatpush3.bf16.msra.mxu1 %v3192_v40 }
 0x125   :  { %2709 = vmatprep.subr.bf16.mxu0 %v3193_v41  ;;  %2731 = vmatprep.subr.bf16.mxu1 %v3194_v42 }
 0x128   :  { %2710 = vmatpush3.bf16.msra.mxu0 %v3195_v43  ;;  %2732 = vmatpush3.bf16.msra.mxu1 %v3196_v44 }
 0x129   :  { %2711 = vmatprep.subr.bf16.mxu0 %v3197_v45  ;;  %2733 = vmatprep.subr.bf16.mxu1 %v3198_v46 }
 0x12c   :  { %2712 = vmatpush3.bf16.msra.mxu0 %v3199_v47  ;;  %2734 = vmatpush3.bf16.msra.mxu1 %v3200_v48 }
 0x12d   :  { %2713 = vmatprep.subr.bf16.mxu0 %v3201_v49  ;;  %2735 = vmatprep.subr.bf16.mxu1 %v3202_v50 }
 0x130   :  { %2714 = vmatpush3.bf16.msra.mxu0 %v3203_v51  ;;  %2736 = vmatpush3.bf16.msra.mxu1 %v3204_v52 }
 0x131   :  { %2715 = vmatprep.subr.bf16.mxu0 %v3205_v53  ;;  %2737 = vmatprep.subr.bf16.mxu1 %v3206_v54 }
 0x134   :  { %2716 = vmatpush3.bf16.msra.mxu0 %v3207_v55  ;;  %2738 = vmatpush3.bf16.msra.mxu1 %v3208_v56  ;;  %v2330_v56 = vld [vmem:[%s3503_s5] sm:$0x1]  ;;  %s3235_s5 = scalar_lea.vmem %s2403_s13, 16 }
 0x135   :  { %2747 = vmatprep.subr.bf16.mxu0 %v3264_v32  ;;  %p3236_p8 = scmp.ne.s32.totalorder %s2403_s13, %s3235_s5  ;;  %p3241_p10 = scmp.lt.s32.totalorder %s3239_s14, %s3235_s5 }
 0x137   :  { %p3242_p11 = por %p3241_p10, %p3240_p9 }
 0x139   :  { %p3243_p12 = pnand %p3242_p11, %p3236_p8 }
 0x19e   :  { %v2335_v57 = vpop.permute.xlu0 %2334 }
 0x19f   :  { %v2340_v60 = vrot.slane %v2335_v57, %v328_v59 }
 0x1ea   :  { %v1789_v4 = vpop.f32.mrb[0].mxu0  ;;  %v1961_v5 = vpop.f32.mrb[0].mxu1 }
 0x1eb   :  { %v2753_v6 = vadd.f32 %v1789_v4, %v329_v0  ;;  %v2757_v7 = vadd.f32 %v1961_v5, %v337_v1  ;;  %v1791_v8 = vpop.f32.mrb[1].mxu0  ;;  %v1963_v9 = vpop.f32.mrb[1].mxu1 }
 0x1ec   :  { %v2754_v10 = vadd.f32 %v1791_v8, %v333_v2  ;;  %v2758_v11 = vadd.f32 %v1963_v9, %v341_v3  ;;  %v1793_v12 = vpop.f32.mrb[2].mxu0  ;;  %v1965_v13 = vpop.f32.mrb[2].mxu1 }
 0x1ed   :  { %v2755_v14 = vadd.f32 %v1793_v12, %v329_v0  ;;  %v2759_v15 = vadd.f32 %v1965_v13, %v337_v1  ;;  %v1795_v16 = vpop.f32.mrb[3].mxu0  ;;  %v1967_v17 = vpop.f32.mrb[3].mxu1  ;;  %v1970_v20 = vmax.f32 %v2753_v6, 0.0  ;;  %v1972_v21 = vmax.f32 %v2757_v7, 0.0 }
 0x1ee   :  { %v2756_v18 = vadd.f32 %v1795_v16, %v333_v2  ;;  %v2760_v19 = vadd.f32 %v1967_v17, %v341_v3  ;;  %v1971_v24 = vmax.f32 %v2754_v10, 0.0  ;;  %v1973_v25 = vmax.f32 %v2758_v11, 0.0 }
 0x1ef   :  { %v1974_v22 = vmax.f32 %v2755_v14, 0.0  ;;  %v1976_v23 = vmax.f32 %v2759_v15, 0.0 }
 0x1f0   :  { %v1975_v26 = vmax.f32 %v2756_v18, 0.0  ;;  %v1977_v27 = vmax.f32 %v2760_v19, 0.0 }
 0x1f1   :  { %v1978_v28 = vpack.c.bf16 %v1974_v22, %v1970_v20  ;;  %v1980_v29 = vpack.c.bf16 %v1976_v23, %v1972_v21 }
 0x1f2   :  { %v1979_v30 = vpack.c.bf16 %v1975_v26, %v1971_v24  ;;  %v1981_v31 = vpack.c.bf16 %v1977_v27, %v1973_v25 }
 0x1f4   :  { %2277 = vmatprep.mubr.bf16.mxu0 %v1979_v30  ;;  %2318 = vmatprep.mubr.bf16.mxu1 %v1981_v31 }
 0x1f5   :  { %2278 = vmatmul.mubr.bf16.vlgmr.msra.gmra.mrb[4].mxu0 %v1978_v28  ;;  %2319 = vmatmul.mubr.bf16.vlgmr.msra.gmra.mrb[4].mxu1 %v1980_v29 }
 0x1f6   :  { %2749 = vmatprep.mubr.msk.bf16.mxu0 %vm3265_vm0, %v3264_v32 }
 0x2c8   :  { %v2717_v35 = vpop.f32.mrb[4].mxu0  ;;  %v2739_v36 = vpop.f32.mrb[4].mxu1 }
 0x2c9   :  { %v2718_v38 = vpop.f32.mrb[5].mxu0  ;;  %v2740_v39 = vpop.f32.mrb[5].mxu1 }
 0x2ca   :  { %v2719_v40 = vadd.f32 %v2718_v38, %v2717_v35  ;;  %v2741_v41 = vadd.f32 %v2740_v39, %v2739_v36  ;;  %v2720_v42 = vpop.f32.mrb[6].mxu0  ;;  %v2742_v43 = vpop.f32.mrb[6].mxu1 }
 0x2cb   :  { %v2721_v44 = vpop.f32.mrb[7].mxu0  ;;  %v2743_v45 = vpop.f32.mrb[7].mxu1 }
 0x2cc   :  { %v2280_v46 = vadd.f32 %v2719_v40, %v2667_v37  ;;  %v2722_v47 = vadd.f32 %v2721_v44, %v2720_v42  ;;  %v2744_v48 = vadd.f32 %v2743_v45, %v2742_v43 }
 0x2ce   :  { %v2321_v49 = vadd.f32 %v2741_v41, %v2280_v46  ;;  %v2283_v50 = vadd.f32 %v2722_v47, %v2667_v37 }
 0x2d0   :  { %v2324_v51 = vadd.f32 %v2744_v48, %v2283_v50  ;;  %v2327_v52 = vmax.f32 %v2321_v49, 0.0 }
 0x2d2   :  { %v2328_v53 = vmax.f32 %v2324_v51, 0.0 }
 0x2d4   :  { %v2329_v54 = vpack.c.bf16 %v2328_v53, %v2327_v52 }
 0x2d6   :  { %v2346_v55 = vsel %vm2341_vm1, %v2329_v54, 0 }
 0x2d7   :  { %2748 = vmatpush3.bf16.xpose.msra.mxu0 %v2346_v55 }
 0x2de   :  { %2750 = vmatmul.mubr.msk.bf16.vlgmr.msra.gmra.mrb[8].mxu0 %vm2341_vm1, %v2330_v56 }
 0x3b1   :  { %v2382_v61 = vpop.f32.mrb[8].mxu0 }
 0x3b2   :  { %v2383_v62 = vadd.f32 %v2382_v61, %v2340_v60  ;;  %v2751_v63 = vpop.f32.mrb[9].mxu0 }
 0x3b3   :  { %v2385_v0 = vpop.f32.mrb[10].mxu0 }
 0x3b4   :  { %v2388_v1 = vsub.f32 0.0, %v2383_v62  ;;  %v2752_v2 = vpop.f32.mrb[11].mxu0 }
 0x3b6   :  { %v2389_v3 = vmul.f32 1.442695, %v2388_v1 }
 0x3b8   :  { %3209 = vpow2.f32 %v2389_v3 }
 0x3c2   :  { %v3210_v4 = vpop.eup %3209 }
 0x3c3   :  { %v2391_v5 = vadd.f32 1.0, %v3210_v4 }
 0x3c5   :  { %3211 = vrcp.f32 %v2391_v5 }
 0x3cf   :  { %v3212_v6 = vpop.eup %3211 }
 0x3d0   :  { %2395 = vst.msk [vmem:[#allocation6] sm:$0x1] %vm2394_vm2, %v3212_v6 }
 0x3d1   :  { %3246 = shalt.err (!%p3243_p12)
}
 0x3d2   :  { %s3247_s16 = scalar_lea.hbm %s3505_s7, 16 }
 0x3d3   :  { %p3248_p13 = scmp.ne.s32.totalorder %s3505_s7, %s3247_s16  ;;  %p3251_p0 = scmp.lt.u32.totalorder %s3247_s16, %s3505_s7 }
 0x3d5   :  { %p3253_p1 = pnand %p3251_p0, %p3248_p13 }
 0x3d7   :  { %3256 = shalt.err (!%p3253_p1)
}
 0x3d8   :  { %2405 = dma.vmem_to_hbm [thread:$0]  %s2403_s13, 16, %s3505_s7, [#allocation5]  }
 0x3d9   :  { %3259 = dma.done.wait [#allocation5], 16  }
 0x3da   :  { %3260 = vsyncadd [#allocation5], 4294967280 }
 0x3db   :  { %2409 = vsyncpa [#allocation4], 1 }
 0x3dc   :  { %2410 = vsyncpa [#allocation5], 1 }

</bundles_post_ra>
